<compile_context>
chip_gen: v7x
topology: tpu7x:2x2x1
jax: 0.10.0
libtpu: 0.0.40
codegen_flags: <defaults>
</compile_context>

<pallas_src>
import math

import jax
import jax.numpy as jnp
from jax import lax
from jax.experimental import pallas as pl
from jax.experimental.pallas import tpu as pltpu


def make_linear_clamp(weight, bias, min_value, max_value):
    """Builds a jitted fn x -> clamp(x @ weight.T + bias, min, max).

    weight: [OUT, IN] f32 (PyTorch Linear layout), bias: [OUT] f32.
    min_value / max_value are compile-time constants baked into the kernel.
    """
    OUT, IN = weight.shape
    # Augmented contraction size: IN features + 1 bias lane, padded to a
    # sublane multiple (8) so the MXU sees an aligned K.
    k_aug = ((IN + 1 + 7) // 8) * 8

    # One-time parameter prep (outside the per-call path):
    #   w_aug[:IN, :]  = weight.T          (pre-transposed, MXU-native layout)
    #   w_aug[IN, :]   = bias              (bias folded into the matmul)
    #   w_aug[IN+1:,:] = 0                 (padding rows contribute nothing)
    w_aug = jnp.zeros((k_aug, OUT), dtype=jnp.float32)
    w_aug = w_aug.at[:IN, :].set(weight.T.astype(jnp.float32))
    w_aug = w_aug.at[IN, :].set(bias.astype(jnp.float32))

    lo = float(min_value)
    hi = float(max_value)

    def kernel(x_ref, w_ref, o_ref):
        # x_ref: [B, k_aug] VMEM, w_ref: [k_aug, OUT] VMEM, o_ref: [B, OUT] VMEM
        y = lax.dot_general(
            x_ref[...],
            w_ref[...],
            dimension_numbers=(((1,), (0,)), ((), ())),
            preferred_element_type=jnp.float32,
        )
        # clamp_min then clamp_max == jnp.clip (matches torch for lo > hi too).
        y = jnp.clip(y, lo, hi)
        if o_ref.dtype != jnp.float32:
            y = y.astype(o_ref.dtype)
        o_ref[...] = y

    @jax.jit
    def fwd(x):
        B = x.shape[0]
        # Augment x with a "1" column (for the bias row) + zero padding.
        # Tiny XLA op; fuses under jit and keeps the pallas_call at 2 operands.
        aug_cols = jnp.zeros((B, k_aug - IN), dtype=x.dtype).at[:, 0].set(1.0)
        x_aug = jnp.concatenate([x, aug_cols], axis=1)

        cost = pl.CostEstimate(
            flops=2 * B * k_aug * OUT,
            transcendentals=0,
            bytes_accessed=4 * (B * k_aug + k_aug * OUT + B * OUT),
        )

        return pl.pallas_call(
            kernel,
            out_shape=jax.ShapeDtypeStruct((B, OUT), x.dtype),
            in_specs=[
                pl.BlockSpec(memory_space=pltpu.VMEM),  # x_aug  [B, k_aug]
                pl.BlockSpec(memory_space=pltpu.VMEM),  # w_aug  [k_aug, OUT]
            ],
            out_specs=pl.BlockSpec(memory_space=pltpu.VMEM),
            cost_estimate=cost,
        )(x_aug, w_aug)

    return fwd


if __name__ == "__main__":
    key = jax.random.PRNGKey(0)
    kx, kw, kb = jax.random.split(key, 3)

    B, IN, OUT = 1, 8, 8
    x1 = jax.random.normal(kx, (B, IN), dtype=jnp.float32)

    # Deterministic "Linear(8, 8)" parameters (Kaiming-uniform-ish bound 1/sqrt(IN))
    bound = 1.0 / math.sqrt(IN)
    weight = jax.random.uniform(kw, (OUT, IN), minval=-bound, maxval=bound,
                                dtype=jnp.float32)
    bias = jax.random.uniform(kb, (OUT,), minval=-bound, maxval=bound,
                              dtype=jnp.float32)

    min_value = -0.5
    max_value = 0.5

    fwd = make_linear_clamp(weight, bias, min_value, max_value)
    out = jax.block_until_ready(fwd(x1))

    # Reference check in plain JAX (matches torch: linear -> clamp_min -> clamp_max)
    ref = jnp.minimum(jnp.maximum(x1 @ weight.T + bias, min_value), max_value)
    assert jnp.allclose(out, ref, atol=1e-5, rtol=1e-5), (out, ref)

    print("KERNEL_OK")
</pallas_src>

<mosaic_0001>
module attributes {stable_mosaic.version = 11 : i64} {
  func.func @kernel(%arg0: memref<1x16xf32, #tpu.memory_space<vmem>>, %arg1: memref<16x8xf32, #tpu.memory_space<vmem>>, %arg2: memref<1x8xf32, #tpu.memory_space<vmem>>) attributes {dimension_semantics = [], scalar_prefetch = 0 : i64, scratch_operands = 0 : i64, tpu.core_type = #tpu.core_type<tc>} {
    %c0 = arith.constant 0 : index
    %c0_0 = arith.constant 0 : index
    %0 = vector.load %arg0[%c0, %c0_0] : memref<1x16xf32, #tpu.memory_space<vmem>>, vector<1x16xf32>
    %c0_1 = arith.constant 0 : index
    %c0_2 = arith.constant 0 : index
    %1 = vector.load %arg1[%c0_1, %c0_2] : memref<16x8xf32, #tpu.memory_space<vmem>>, vector<16x8xf32>
    %cst = arith.constant dense<0.000000e+00> : vector<1x8xf32>
    %2 = tpu.matmul %0, %1, %cst {dimension_numbers = #tpu.dot_dimension_numbers<[1], [0], [0], [1], [0, 0, 1, 1], [], []>} : vector<1x16xf32>, vector<16x8xf32>, vector<1x8xf32> -> vector<1x8xf32>
    %cst_3 = arith.constant -5.000000e-01 : f32
    %cst_4 = arith.constant 5.000000e-01 : f32
    %3 = vector.broadcast %cst_3 : f32 to vector<1x8xf32>
    %4 = arith.maximumf %3, %2 : vector<1x8xf32>
    %5 = vector.broadcast %cst_4 : f32 to vector<1x8xf32>
    %6 = arith.minimumf %5, %4 : vector<1x8xf32>
    %c0_5 = arith.constant 0 : index
    %c0_6 = arith.constant 0 : index
    %7 = vector.load %arg2[%c0_5, %c0_6] : memref<1x8xf32, #tpu.memory_space<vmem>>, vector<1x8xf32>
    tpu.vector_store %arg2[%c0_5, %c0_6], %6 {strides = array<i32>} : memref<1x8xf32, #tpu.memory_space<vmem>>, vector<1x8xf32>,
    return
  }
}

</mosaic_0001>

<bundles_post_ra>
// kernel: fwd.1
= control target key start
LH: loop header
LB: loop body
LE: loop exit
PB: predicated region body
PF: predicated region fallthrough
CT: control target
= control target key end

     0   :  { %v150_v2 = vmov 0.0|0.0   ;;  %vm151_vm0 = vmmov 0   ;;  %v152_v4 = vmov 0.0   ;;  %s190_s0 = inlined_call_operand.vmem [shape: f32[1,16], index: 0, kind: input, shape index: {}]   ;;  %s191_s1 = inlined_call_operand.vmem [shape: f32[16,8], index: 1, kind: input, shape index: {}]   ;;  %s192_s2 = inlined_call_operand.hbm [shape: f32[1,8], index: 2, kind: output, shape index: {}]  }
   0x1   :  { %v13_v0 = vld [vmem:[%s191_s1] sm:$0xff]  ;;  %v14_v1 = vld [vmem:[%s191_s1 + $0x8] sm:$0xff]  ;;  %119 = vmatprep.subr.bf16.mxu0 %v150_v2  ;;  %116 = vmatprep.mubr.msk.f32.mxu0 %vm151_vm0, %v152_v4 }
   0x2   :  { %v120_v3 = vpack.c.bf16 %v14_v1, %v13_v0 }
   0x3   :  { %7 = vsyncpa [#allocation3], 0  ;;  %v12_v5 = vld [vmem:[%s190_s0] sm:$0x1]  ;;  %vm15_vm1 = vcmask 130048   ;;  %s153_s15 = smov [#allocation2]  }
   0x4   :  { %121 = vmatpush3.bf16.msra.mxu0 %v120_v3  ;;  %s99_s16 = sshll.u32 %s153_s15, 4  ;;  %vm91_vm2 = vcmask 57344   ;;  %s100_s16 = int_to_ptr.vmem [resolvable:$true] %s99_s16 }
   0x5   :  { %s126_s1 = scalar_lea.vmem %s100_s16, 16  ;;  %s130_s17 = scalar_lea.vmem %s100_s16, 32 }
   0x6   :  { %p127_p0 = scmp.ne.s32.totalorder %s100_s16, %s126_s1  ;;  %p131_p1 = scmp.lt.s32.totalorder %s100_s16, %s100_s16 }
   0x7   :  { %117 = vmatmul.mubr.msk.f32.vlgmr.msra.gmra.mrb[0].mxu0 %vm15_vm1, %v12_v5  ;;  %p132_p2 = scmp.lt.s32.totalorder %s130_s17, %s126_s1 }
   0x9   :  { %p133_p3 = por %p132_p2, %p131_p1 }
   0xb   :  { %p134_p4 = pnand %p133_p3, %p127_p0 }
  0xda   :  { %v85_v6 = vpop.f32.mrb[0].mxu0 }
  0xdb   :  { %v108_v7 = vclamps-f32 %v85_v6, 0.5  ;;  %v118_v8 = vpop.f32.mrb[1].mxu0 }
  0xdd   :  { %92 = vst.msk [vmem:[#allocation2] sm:$0x1] %vm91_vm2, %v108_v7 }
  0xde   :  { %137 = shalt.err (!%p134_p4)
}
  0xdf   :  { %s138_s19 = scalar_lea.hbm %s192_s2, 16 }
  0xe0   :  { %p139_p5 = scmp.ne.s32.totalorder %s192_s2, %s138_s19  ;;  %p142_p6 = scmp.lt.u32.totalorder %s138_s19, %s192_s2 }
  0xe2   :  { %p144_p7 = pnand %p142_p6, %p139_p5 }
  0xe4   :  { %147 = shalt.err (!%p144_p7)
}
  0xe5   :  { %102 = dma.vmem_to_hbm [thread:$0]  %s100_s16, 16, %s192_s2, [#allocation3]  }
  0xe6   :  { %148 = dma.done.wait [#allocation3], 16  }
  0xe7   :  { %149 = vsyncadd [#allocation3], 4294967280 }
  0xe8   :  { %106 = vsyncpa [#allocation3], 1 }

</bundles_post_ra>
